<compile_context>
chip_gen: v6e
topology: v6e:2x2x1
jax: 0.10.0
libtpu: 0.0.40
codegen_flags: <defaults>
</compile_context>

<pallas_src>
import jax
import jax.numpy as jnp
from jax.experimental import pallas as pl
from jax.experimental.pallas import tpu as pltpu


def _round_up(x, m):
    return (x + m - 1) // m * m


def _leaky_relu(x, slope=0.1):
    return jnp.where(x > 0, x, slope * x)


def _vmem_capacity_bytes():
    try:
        return int(pltpu.get_tpu_info().vmem_capacity_bytes)
    except Exception:
        return 64 << 20  # v7x per-TensorCore VMEM; safe lower bound everywhere.


def _pick_tiles(batch, in_pad, vmem_budget):
    """Choose (tile_b, tile_k, in_pad2) so the pipelined footprint fits the budget."""
    # K tile: whole in_pad when reasonable, else split into near-equal 128-multiples
    # (padded columns are exact zeros in both x and w1, so extra padding is harmless).
    max_tile_k = 8 * 1024
    if in_pad <= max_tile_k:
        tile_k = in_pad
    else:
        k_steps = -(-in_pad // max_tile_k)
        tile_k = _round_up(-(-in_pad // k_steps), 128)
    in_pad2 = _round_up(in_pad, tile_k)

    # Conservative footprint model: assume everything is double-buffered.
    fixed = (2 * tile_k * 128 * 2                 # w1 tile (bf16)
             + 2 * 128 * 128 * 2                  # w2 (bf16)
             + 2 * (128 + 128 + 128 + 1) * 4)     # b1, b2, w3 row, b3 (f32)
    per_row = (2 * tile_k * 2                     # x tile (bf16)
               + 128 * 4                          # f32 accumulator scratch
               + 2 * 1 * 4)                       # (tile_b, 1) output
    tile_b = (vmem_budget - fixed) // per_row
    tile_b = max(16, min(4096, (tile_b // 16) * 16))

    b16 = _round_up(batch, 16)
    tile_b = min(tile_b, b16)
    # Keep >=2 batch steps for reasonably large batches so the "parallel" axis
    # can shard across the 2 v7x TensorCores.
    if tile_b >= b16 and b16 >= 256:
        tile_b = _round_up(b16 // 2, 16)
    return tile_b, tile_k, in_pad2


def _value_net_kernel(x_ref, w1_ref, b1_ref, w2_ref, b2_ref, w3_ref, b3_ref,
                      o_ref, acc_ref):
    k = pl.program_id(1)

    @pl.when(k == 0)
    def _():
        acc_ref[...] = jnp.zeros_like(acc_ref)

    # Layer 1 partial sum: bf16 (tile_b, tile_k) @ bf16 (tile_k, 128) -> f32 acc.
    acc_ref[...] += jnp.dot(x_ref[...], w1_ref[...],
                            preferred_element_type=jnp.float32)

    @pl.when(k == pl.num_programs(1) - 1)
    def _():
        h1 = _leaky_relu(acc_ref[...] + b1_ref[...])
        # Layer 2: bf16 operands (native MXU rate on v5e/v6e/v7x), f32 accumulate.
        h2 = jnp.dot(h1.astype(jnp.bfloat16), w2_ref[...],
                     preferred_element_type=jnp.float32)
        h2 = _leaky_relu(h2 + b2_ref[...])
        # Layer 3 (16 -> 1): VPU multiply + XLU lane reduce. Padded columns of
        # h2 and w3 are exactly zero, so only the 16 real columns contribute.
        out = jnp.sum(h2 * w3_ref[...], axis=-1, keepdims=True) + b3_ref[...]
        o_ref[...] = out.astype(o_ref.dtype)


def value_net_forward(feature_vector, params, *, tile_b=None):
    """Pallas forward pass of ValueNet.

    feature_vector: any shape (B, ...) - flattened to (B, input_size) like nn.Flatten.
    params: dict with w1 (in,128), b1 (1,128), w2 (128,16), b2 (1,16),
            w3 (16,1), b3 (1,1)  (weights stored as (in, out), i.e. x @ W).
    """
    b = feature_vector.shape[0]
    x = feature_vector.reshape(b, -1)
    in_size = x.shape[1]
    in_pad = _round_up(in_size, 128)

    vmem_cap = _vmem_capacity_bytes()
    budget = max(vmem_cap - (16 << 20), 16 << 20)   # generation-aware cap.

    auto_tile_b, tile_k, in_pad = _pick_tiles(b, in_pad, budget)
    if tile_b is None:
        tile_b = auto_tile_b
    tile_b = max(16, _round_up(tile_b, 16))
    b_pad = _round_up(b, tile_b)
    k_steps = in_pad // tile_k

    # ---- operand prep: cast first, pad only when needed (padding is exact 0) ----
    x_bf = x.astype(jnp.bfloat16)
    if b_pad != b or in_pad != in_size:
        x_bf = jnp.pad(x_bf, ((0, b_pad - b), (0, in_pad - in_size)))

    w1 = params["w1"].astype(jnp.bfloat16)
    if in_pad != in_size:
        w1 = jnp.pad(w1, ((0, in_pad - in_size), (0, 0)))
    b1 = params["b1"].astype(jnp.float32).reshape(1, 128)

    w2 = jnp.pad(params["w2"].astype(jnp.bfloat16), ((0, 0), (0, 128 - 16)))
    b2 = jnp.pad(params["b2"].astype(jnp.float32).reshape(1, 16),
                 ((0, 0), (0, 128 - 16)))
    w3 = jnp.pad(params["w3"].astype(jnp.float32).reshape(1, 16),
                 ((0, 0), (0, 128 - 16)))
    b3 = params["b3"].astype(jnp.float32).reshape(1, 1)

    grid = (b_pad // tile_b, k_steps)

    def const_block(arr):
        # Full-array block, resident across all grid steps (constant index_map).
        return pl.BlockSpec(arr.shape, lambda i, k: (0,) * arr.ndim)

    needed_vmem = (2 * tile_b * tile_k * 2          # double-buffered bf16 x tiles
                   + 2 * tile_k * 128 * 2           # bf16 w1 tile (assume 2 bufs)
                   + 2 * 128 * 128 * 2              # bf16 w2 (assume 2 bufs)
                   + 2 * (128 * 3 + 1) * 4          # biases + w3 row (assume 2 bufs)
                   + tile_b * 128 * 4               # f32 accumulator scratch
                   + 2 * tile_b * 4)                # double-buffered (tile_b,1) out
    vmem_limit = int(min(budget, max(32 << 20, needed_vmem + (8 << 20))))

    flops = 2 * b_pad * (in_pad * 128 + 128 * 128) + 3 * b_pad * 128
    bytes_accessed = (x_bf.size * 2 + w1.size * 2 + w2.size * 2
                      + (b1.size + b2.size + w3.size + b3.size) * 4
                      + b_pad * 4)

    out = pl.pallas_call(
        _value_net_kernel,
        out_shape=jax.ShapeDtypeStruct((b_pad, 1), jnp.float32),
        grid=grid,
        in_specs=[
            pl.BlockSpec((tile_b, tile_k), lambda i, k: (i, k)),   # x tiles stream
            pl.BlockSpec((tile_k, 128), lambda i, k: (k, 0)),      # w1 K-tiles
            const_block(b1), const_block(w2), const_block(b2),
            const_block(w3), const_block(b3),
        ],
        out_specs=pl.BlockSpec((tile_b, 1), lambda i, k: (i, 0)),
        scratch_shapes=[pltpu.VMEM((tile_b, 128), jnp.float32)],
        compiler_params=pltpu.CompilerParams(
            dimension_semantics=("parallel", "arbitrary"),
            vmem_limit_bytes=vmem_limit,
        ),
        cost_estimate=pl.CostEstimate(
            flops=flops, bytes_accessed=bytes_accessed, transcendentals=0),
    )(x_bf, w1, b1, w2, b2, w3, b3)

    return out if b_pad == b else out[:b]


def init_params(key, input_size):
    """Deterministic init (Kaiming-uniform-ish like torch default Linear init)."""
    def linear(key, fan_in, fan_out):
        kw, kb = jax.random.split(key)
        bound = 1.0 / jnp.sqrt(fan_in)
        w = jax.random.uniform(kw, (fan_in, fan_out), jnp.float32, -bound, bound)
        bvec = jax.random.uniform(kb, (1, fan_out), jnp.float32, -bound, bound)
        return w, bvec

    k1, k2, k3 = jax.random.split(key, 3)
    w1, b1 = linear(k1, input_size, 128)
    w2, b2 = linear(k2, 128, 16)
    w3, b3 = linear(k3, 16, 1)
    return {"w1": w1, "b1": b1, "w2": w2, "b2": b2, "w3": w3, "b3": b3}


def _reference_forward(feature_vector, params):
    x = feature_vector.reshape(feature_vector.shape[0], -1).astype(jnp.float32)
    h1 = _leaky_relu(x @ params["w1"] + params["b1"])
    h2 = _leaky_relu(h1 @ params["w2"] + params["b2"])
    return h2 @ params["w3"] + params["b3"]


if __name__ == "__main__":
    key = jax.random.PRNGKey(0)
    k_in, k_p = jax.random.split(key)

    # Small example: batch=8, feature_vector of shape (8, 4, 16) -> input_size=64
    batch = 8
    feature_vector = jax.random.normal(k_in, (batch, 4, 16), jnp.float32)
    input_size = 4 * 16
    params = init_params(k_p, input_size)

    value = value_net_forward(feature_vector, params)
    value = jax.block_until_ready(value)

    ref = _reference_forward(feature_vector, params)
    assert value.shape == (batch, 1), value.shape
    # bf16 layer-1/2 streams -> slightly loose tolerance vs the f32 reference.
    assert jnp.allclose(value, ref, atol=2e-2, rtol=2e-2), (value, ref)

    print("KERNEL_OK")
</pallas_src>

<mosaic_0001>
module attributes {stable_mosaic.version = 11 : i64} {
  func.func @_value_net_kernel(%arg0: i32, %arg1: i32, %arg2: memref<16x128xbf16, #tpu.memory_space<vmem>>, %arg3: memref<128x128xbf16, #tpu.memory_space<vmem>>, %arg4: memref<1x128xf32, #tpu.memory_space<vmem>>, %arg5: memref<128x128xbf16, #tpu.memory_space<vmem>>, %arg6: memref<1x128xf32, #tpu.memory_space<vmem>>, %arg7: memref<1x128xf32, #tpu.memory_space<vmem>>, %arg8: memref<1x1xf32, #tpu.memory_space<vmem>>, %arg9: memref<16x1xf32, #tpu.memory_space<vmem>>, %arg10: memref<16x128xf32, #tpu.memory_space<vmem>>) attributes {dimension_semantics = [#tpu.dimension_semantics<parallel>, #tpu.dimension_semantics<arbitrary>], iteration_bounds = array<i64: 1, 1>, scalar_prefetch = 0 : i64, scratch_operands = 1 : i64, tpu.core_type = #tpu.core_type<tc>, window_params = [{transform_indices = @transform_0, window_bounds = array<i64: 16, 128>}, {transform_indices = @transform_1, window_bounds = array<i64: 128, 128>}, {pipeline_mode = #tpu.pipeline_mode<synchronous>, transform_indices = @transform_2, window_bounds = array<i64: 1, 128>}, {pipeline_mode = #tpu.pipeline_mode<synchronous>, transform_indices = @transform_3, window_bounds = array<i64: 128, 128>}, {pipeline_mode = #tpu.pipeline_mode<synchronous>, transform_indices = @transform_4, window_bounds = array<i64: 1, 128>}, {pipeline_mode = #tpu.pipeline_mode<synchronous>, transform_indices = @transform_5, window_bounds = array<i64: 1, 128>}, {pipeline_mode = #tpu.pipeline_mode<synchronous>, transform_indices = @transform_6, window_bounds = array<i64: 1, 1>}, {transform_indices = @transform_7, window_bounds = array<i64: 16, 1>}]} {
    %c0_i32 = arith.constant 0 : i32
    %0 = arith.cmpi eq, %arg1, %c0_i32 : i32
    %1 = arith.extui %0 : i1 to i32
    %c0_i32_0 = arith.constant 0 : i32
    %2 = arith.cmpi ne, %1, %c0_i32_0 : i32
    scf.if %2 {
      %cst_10 = arith.constant 0.000000e+00 : f32
      %12 = vector.broadcast %cst_10 : f32 to vector<16x128xf32>
      %c0_11 = arith.constant 0 : index
      %c0_12 = arith.constant 0 : index
      %13 = vector.load %arg10[%c0_11, %c0_12] : memref<16x128xf32, #tpu.memory_space<vmem>>, vector<16x128xf32>
      tpu.vector_store %arg10[%c0_11, %c0_12], %12 {strides = array<i32>} : memref<16x128xf32, #tpu.memory_space<vmem>>, vector<16x128xf32>,
    } else {
    }
    %c0 = arith.constant 0 : index
    %c0_1 = arith.constant 0 : index
    %3 = vector.load %arg10[%c0, %c0_1] : memref<16x128xf32, #tpu.memory_space<vmem>>, vector<16x128xf32>
    %c0_2 = arith.constant 0 : index
    %c0_3 = arith.constant 0 : index
    %4 = vector.load %arg2[%c0_2, %c0_3] : memref<16x128xbf16, #tpu.memory_space<vmem>>, vector<16x128xbf16>
    %c0_4 = arith.constant 0 : index
    %c0_5 = arith.constant 0 : index
    %5 = vector.load %arg3[%c0_4, %c0_5] : memref<128x128xbf16, #tpu.memory_space<vmem>>, vector<128x128xbf16>
    %cst = arith.constant dense<0.000000e+00> : vector<16x128xf32>
    %6 = tpu.matmul %4, %5, %cst {dimension_numbers = #tpu.dot_dimension_numbers<[1], [0], [0], [1], [0, 0, 1, 1], [], []>} : vector<16x128xbf16>, vector<128x128xbf16>, vector<16x128xf32> -> vector<16x128xf32>
    %7 = arith.addf %3, %6 : vector<16x128xf32>
    %c0_6 = arith.constant 0 : index
    %c0_7 = arith.constant 0 : index
    %8 = vector.load %arg10[%c0_6, %c0_7] : memref<16x128xf32, #tpu.memory_space<vmem>>, vector<16x128xf32>
    tpu.vector_store %arg10[%c0_6, %c0_7], %7 {strides = array<i32>} : memref<16x128xf32, #tpu.memory_space<vmem>>, vector<16x128xf32>,
    %c0_i32_8 = arith.constant 0 : i32
    %9 = arith.cmpi eq, %arg1, %c0_i32_8 : i32
    %10 = arith.extui %9 : i1 to i32
    %c0_i32_9 = arith.constant 0 : i32
    %11 = arith.cmpi ne, %10, %c0_i32_9 : i32
    scf.if %11 {
      %c0_10 = arith.constant 0 : index
      %c0_11 = arith.constant 0 : index
      %12 = vector.load %arg10[%c0_10, %c0_11] : memref<16x128xf32, #tpu.memory_space<vmem>>, vector<16x128xf32>
      %c0_12 = arith.constant 0 : index
      %c0_13 = arith.constant 0 : index
      %13 = vector.load %arg4[%c0_12, %c0_13] : memref<1x128xf32, #tpu.memory_space<vmem>>, vector<1x128xf32>
      %14 = vector.broadcast %13 : vector<1x128xf32> to vector<16x128xf32>
      %15 = arith.addf %12, %14 : vector<16x128xf32>
      %cst_14 = arith.constant 0.000000e+00 : f32
      %16 = vector.broadcast %cst_14 : f32 to vector<16x128xf32>
      %17 = arith.cmpf ogt, %15, %16 : vector<16x128xf32>
      %cst_15 = arith.constant 1.000000e-01 : f32
      %18 = vector.broadcast %cst_15 : f32 to vector<16x128xf32>
      %19 = arith.mulf %18, %15 : vector<16x128xf32>
      %20 = arith.select %17, %15, %19 : vector<16x128xi1>, vector<16x128xf32>
      %21 = arith.truncf %20 : vector<16x128xf32> to vector<16x128xbf16>
      %c0_16 = arith.constant 0 : index
      %c0_17 = arith.constant 0 : index
      %22 = vector.load %arg5[%c0_16, %c0_17] : memref<128x128xbf16, #tpu.memory_space<vmem>>, vector<128x128xbf16>
      %cst_18 = arith.constant dense<0.000000e+00> : vector<16x128xf32>
      %23 = tpu.matmul %21, %22, %cst_18 {dimension_numbers = #tpu.dot_dimension_numbers<[1], [0], [0], [1], [0, 0, 1, 1], [], []>} : vector<16x128xbf16>, vector<128x128xbf16>, vector<16x128xf32> -> vector<16x128xf32>
      %c0_19 = arith.constant 0 : index
      %c0_20 = arith.constant 0 : index
      %24 = vector.load %arg6[%c0_19, %c0_20] : memref<1x128xf32, #tpu.memory_space<vmem>>, vector<1x128xf32>
      %25 = vector.broadcast %24 : vector<1x128xf32> to vector<16x128xf32>
      %26 = arith.addf %23, %25 : vector<16x128xf32>
      %cst_21 = arith.constant 0.000000e+00 : f32
      %27 = vector.broadcast %cst_21 : f32 to vector<16x128xf32>
      %28 = arith.cmpf ogt, %26, %27 : vector<16x128xf32>
      %cst_22 = arith.constant 1.000000e-01 : f32
      %29 = vector.broadcast %cst_22 : f32 to vector<16x128xf32>
      %30 = arith.mulf %29, %26 : vector<16x128xf32>
      %31 = arith.select %28, %26, %30 : vector<16x128xi1>, vector<16x128xf32>
      %c0_23 = arith.constant 0 : index
      %c0_24 = arith.constant 0 : index
      %32 = vector.load %arg7[%c0_23, %c0_24] : memref<1x128xf32, #tpu.memory_space<vmem>>, vector<1x128xf32>
      %33 = vector.broadcast %32 : vector<1x128xf32> to vector<16x128xf32>
      %34 = arith.mulf %31, %33 : vector<16x128xf32>
      %cst_25 = arith.constant dense<0.000000e+00> : vector<16xf32>
      %35 = vector.multi_reduction <add>, %34, %cst_25 [1] : vector<16x128xf32> to vector<16xf32>
      %36 = vector.shape_cast %35 : vector<16xf32> to vector<16x1xf32>
      %c0_26 = arith.constant 0 : index
      %c0_27 = arith.constant 0 : index
      %37 = vector.load %arg8[%c0_26, %c0_27] : memref<1x1xf32, #tpu.memory_space<vmem>>, vector<1x1xf32>
      %38 = vector.broadcast %37 : vector<1x1xf32> to vector<16x1xf32>
      %39 = arith.addf %36, %38 : vector<16x1xf32>
      %c0_28 = arith.constant 0 : index
      %c0_29 = arith.constant 0 : index
      %40 = vector.load %arg9[%c0_28, %c0_29] : memref<16x1xf32, #tpu.memory_space<vmem>>, vector<16x1xf32>
      tpu.vector_store %arg9[%c0_28, %c0_29], %39 {strides = array<i32>} : memref<16x1xf32, #tpu.memory_space<vmem>>, vector<16x1xf32>,
    } else {
    }
    return
  }
  func.func @transform_0(%arg0: i32, %arg1: i32) -> (i32, i32) {
    %c0_i32 = arith.constant 0 : i32
    return %arg0, %arg1 : i32, i32
  }
  func.func @transform_1(%arg0: i32, %arg1: i32) -> (i32, i32) {
    %c0_i32 = arith.constant 0 : i32
    %c0_i32_0 = arith.constant 0 : i32
    return %arg1, %c0_i32 : i32, i32
  }
  func.func @transform_2(%arg0: i32, %arg1: i32) -> (i32, i32) {
    %c0_i32 = arith.constant 0 : i32
    %c0_i32_0 = arith.constant 0 : i32
    %c0_i32_1 = arith.constant 0 : i32
    return %c0_i32, %c0_i32_0 : i32, i32
  }
  func.func @transform_3(%arg0: i32, %arg1: i32) -> (i32, i32) {
    %c0_i32 = arith.constant 0 : i32
    %c0_i32_0 = arith.constant 0 : i32
    %c0_i32_1 = arith.constant 0 : i32
    return %c0_i32, %c0_i32_0 : i32, i32
  }
  func.func @transform_4(%arg0: i32, %arg1: i32) -> (i32, i32) {
    %c0_i32 = arith.constant 0 : i32
    %c0_i32_0 = arith.constant 0 : i32
    %c0_i32_1 = arith.constant 0 : i32
    return %c0_i32, %c0_i32_0 : i32, i32
  }
  func.func @transform_5(%arg0: i32, %arg1: i32) -> (i32, i32) {
    %c0_i32 = arith.constant 0 : i32
    %c0_i32_0 = arith.constant 0 : i32
    %c0_i32_1 = arith.constant 0 : i32
    return %c0_i32, %c0_i32_0 : i32, i32
  }
  func.func @transform_6(%arg0: i32, %arg1: i32) -> (i32, i32) {
    %c0_i32 = arith.constant 0 : i32
    %c0_i32_0 = arith.constant 0 : i32
    %c0_i32_1 = arith.constant 0 : i32
    return %c0_i32, %c0_i32_0 : i32, i32
  }
  func.func @transform_7(%arg0: i32, %arg1: i32) -> (i32, i32) {
    %c0_i32 = arith.constant 0 : i32
    %c0_i32_0 = arith.constant 0 : i32
    return %arg0, %c0_i32 : i32, i32
  }
}

</mosaic_0001>

<bundles_post_ra>
// kernel: tpu_custom_call.1
= control target key start
LH: loop header
LB: loop body
LE: loop exit
PB: predicated region body
PF: predicated region fallthrough
CT: control target
= control target key end

     0   :  { %s606_s0 = inlined_call_operand.hbm [shape: bf16[16,128], index: 0, kind: input, shape index: {}]   ;;  %s607_s1 = inlined_call_operand.hbm [shape: bf16[128,128], index: 1, kind: input, shape index: {}]   ;;  %s608_s2 = inlined_call_operand.vmem [shape: f32[1,128], index: 2, kind: input, shape index: {}]   ;;  %s609_s3 = inlined_call_operand.hbm [shape: bf16[128,128], index: 3, kind: input, shape index: {}]   ;;  %s610_s4 = inlined_call_operand.vmem [shape: f32[1,128], index: 4, kind: input, shape index: {}]   ;;  %s611_s5 = inlined_call_operand.vmem [shape: f32[1,128], index: 5, kind: input, shape index: {}]   ;;  %s612_s6 = inlined_call_operand.<no memory space> [shape: f32[1,1], index: 6, kind: input, shape index: {}]   ;;  %s613_s7 = inlined_call_operand.vmem [shape: f32[16,1], index: 7, kind: output, shape index: {}]  }
   0x1   :  { %v12_v0 = vstv %s612_s6 }
   0x2   :  { %13 = vst [vmem:[#allocation3] sm:$0x1] %v12_v0 }
   0x3   :  { %14 = vsyncpa [#allocation5], 0 }
   0x4   :  { %15 = vsyncpa [#allocation7], 0  ;;  %s532_s26 = smov [#allocation6]   ;;  %s533_s28 = smov [#allocation4]  }
   0x5   :  { %s33_s27 = sshll.u32 %s532_s26, 4  ;;  %s21_s29 = sshll.u32 %s533_s28, 4  ;;  %s34_s27 = int_to_ptr.vmem [resolvable:$true] %s33_s27  ;;  %s22_s29 = int_to_ptr.vmem [resolvable:$true] %s21_s29 }
   0x6   :  { %s476_s30 = scalar_lea.vmem %s34_s27, 1024  ;;  %p481_p1 = scmp.lt.s32.totalorder %s34_s27, %s34_s27 }
   0x7   :  { %p477_p0 = scmp.ne.s32.totalorder %s34_s27, %s476_s30  ;;  %p482_p2 = scmp.lt.s32.totalorder %s476_s30, %s476_s30 }
   0x9   :  { %p483_p3 = por %p482_p2, %p481_p1 }
   0xb   :  { %p484_p4 = pnand %p483_p3, %p477_p0 }
   0xd   :  { %487 = shalt.err (!%p484_p4)
}
   0xe   :  { %s534_s8 = smov 64   ;;  %s535_s9 = smov 4  }
   0xf   :  { %39 = dma.hbm_to_vmem [thread:$0]  %s607_s1, 1024, %s34_s27, [#allocation7], %s534_s8, %s534_s8, %s535_s9  }
  0x10   :  { %s496_s11 = scalar_lea.vmem %s22_s29, 128  ;;  %p501_p6 = scmp.lt.s32.totalorder %s22_s29, %s22_s29 }
  0x11   :  { %p497_p5 = scmp.ne.s32.totalorder %s22_s29, %s496_s11  ;;  %p502_p7 = scmp.lt.s32.totalorder %s496_s11, %s496_s11 }
  0x13   :  { %p503_p8 = por %p502_p7, %p501_p6 }
  0x15   :  { %p504_p9 = pnand %p503_p8, %p497_p5 }
  0x17   :  { %507 = shalt.err (!%p504_p9)
}
  0x18   :  { %27 = dma.hbm_to_vmem [thread:$0]  %s606_s0, 128, %s22_s29, [#allocation5], %s534_s8, %s534_s8, %s535_s9  }
  0x19   :  { %s536_s14 = smov [#allocation8]  }
  0x1a   :  { %s47_s15 = sshll.u32 %s536_s14, 4  ;;  %s48_s15 = int_to_ptr.vmem [resolvable:$true] %s47_s15 }
  0x1b   :  { %s516_s16 = scalar_lea.vmem %s48_s15, 1024  ;;  %p521_p11 = scmp.lt.s32.totalorder %s48_s15, %s48_s15 }
  0x1c   :  { %p517_p10 = scmp.ne.s32.totalorder %s48_s15, %s516_s16  ;;  %p522_p12 = scmp.lt.s32.totalorder %s516_s16, %s516_s16 }
  0x1e   :  { %p523_p13 = por %p522_p12, %p521_p11 }
  0x20   :  { %p524_p0 = pnand %p523_p13, %p517_p10 }
  0x22   :  { %527 = shalt.err (!%p524_p0)
}
  0x23   :  { %53 = dma.hbm_to_vmem [thread:$0]  %s609_s3, 1024, %s48_s15, [#allocation7], %s534_s8, %s534_s8, %s535_s9  }
  0x24   :  { %528 = dma.done.wait [#allocation5], 128  }
  0x25   :  { %529 = vsyncadd [#allocation5], 4294967168 }
  0x26   :  { %530 = dma.done.wait [#allocation7], 2048  }
  0x27   :  { %531 = vsyncadd [#allocation7], 4294965248  ;;  %v537_v1 = vmov 0.0   ;;  %vm538_vm0 = vmmov 0   ;;  %v451_v2 = vld [vmem:[#allocation6 + $0x38] sm:$0xff]   ;;  %v452_v3 = vld [vmem:[#allocation6 + $0x30] sm:$0xff]  }
  0x28   :  { %404 = vmatprep.subr.bf16.mxu0 %v537_v1  ;;  %420 = vmatprep.mubr.msk.bf16.mxu0 %vm538_vm0, %v537_v1  ;;  %v453_v4 = vld [vmem:[#allocation6 + $0x28] sm:$0xff]   ;;  %v460_v5 = vld [vmem:[#allocation8 + $0x38] sm:$0xff]   ;;  %v454_v6 = vld [vmem:[#allocation6 + $0x20] sm:$0xff]   ;;  %vm356_vm5 = vcmask 7168  }
  0x29   :  { %424 = vmatprep.subr.bf16.mxu1 %v537_v1  ;;  %440 = vmatprep.mubr.msk.bf16.mxu1 %vm538_vm0, %v537_v1  ;;  %v461_v7 = vld [vmem:[#allocation8 + $0x30] sm:$0xff]   ;;  %v455_v8 = vld [vmem:[#allocation6 + $0x18] sm:$0xff]   ;;  %v462_v9 = vld [vmem:[#allocation8 + $0x28] sm:$0xff]  }
  0x2a   :  { %405 = vmatpush3.bf16.msra.mxu0 %v451_v2  ;;  %425 = vmatpush3.bf16.msra.mxu1 %v460_v5  ;;  %v456_v10 = vld [vmem:[#allocation6 + $0x10] sm:$0xff]   ;;  %v463_v11 = vld [vmem:[#allocation8 + $0x20] sm:$0xff]   ;;  %v457_v12 = vld [vmem:[#allocation6 + $0x8] sm:$0xff]  }
  0x2b   :  { %406 = vmatprep.subr.bf16.mxu0 %v537_v1  ;;  %426 = vmatprep.subr.bf16.mxu1 %v537_v1  ;;  %v464_v13 = vld [vmem:[#allocation8 + $0x18] sm:$0xff]   ;;  %v458_v14 = vld [vmem:[#allocation6] sm:$0xff]   ;;  %v465_v16 = vld [vmem:[#allocation8 + $0x10] sm:$0xff]  }
  0x2c   :  { %v459_v15 = vld [vmem:[#allocation4] sm:$0xff]   ;;  %v466_v17 = vld [vmem:[#allocation8 + $0x8] sm:$0xff]   ;;  %v467_v18 = vld [vmem:[#allocation8] sm:$0xff]  }
  0x2d   :  { %v374_v19 = vld [vmem:[%s608_s2] ss:$0 sm:$0xff] }
  0x2e   :  { %407 = vmatpush3.bf16.msra.mxu0 %v452_v3  ;;  %427 = vmatpush3.bf16.msra.mxu1 %v461_v7  ;;  %v375_v31 = vld [vmem:[%s610_s4] ss:$0 sm:$0xff] }
  0x2f   :  { %408 = vmatprep.subr.bf16.mxu0 %v537_v1  ;;  %428 = vmatprep.subr.bf16.mxu1 %v537_v1  ;;  %v384_v36 = vld [vmem:[%s611_s5] ss:$0 sm:$0xff] }
  0x30   :  { %v385_v45 = vld [vmem:[#allocation3] ss:$0 sm:$0xff] }
  0x32   :  { %409 = vmatpush3.bf16.msra.mxu0 %v453_v4  ;;  %429 = vmatpush3.bf16.msra.mxu1 %v462_v9 }
  0x33   :  { %410 = vmatprep.subr.bf16.mxu0 %v537_v1  ;;  %430 = vmatprep.subr.bf16.mxu1 %v537_v1 }
  0x36   :  { %411 = vmatpush3.bf16.msra.mxu0 %v454_v6  ;;  %431 = vmatpush3.bf16.msra.mxu1 %v463_v11 }
  0x37   :  { %412 = vmatprep.subr.bf16.mxu0 %v537_v1  ;;  %432 = vmatprep.subr.bf16.mxu1 %v537_v1 }
  0x3a   :  { %413 = vmatpush3.bf16.msra.mxu0 %v455_v8  ;;  %433 = vmatpush3.bf16.msra.mxu1 %v464_v13 }
  0x3b   :  { %414 = vmatprep.subr.bf16.mxu0 %v537_v1  ;;  %434 = vmatprep.subr.bf16.mxu1 %v537_v1 }
  0x3e   :  { %415 = vmatpush3.bf16.msra.mxu0 %v456_v10  ;;  %435 = vmatpush3.bf16.msra.mxu1 %v465_v16 }
  0x3f   :  { %416 = vmatprep.subr.bf16.mxu0 %v537_v1  ;;  %436 = vmatprep.subr.bf16.mxu1 %v537_v1 }
  0x42   :  { %417 = vmatpush3.bf16.msra.mxu0 %v457_v12  ;;  %437 = vmatpush3.bf16.msra.mxu1 %v466_v17 }
  0x43   :  { %418 = vmatprep.subr.bf16.mxu0 %v537_v1  ;;  %438 = vmatprep.subr.bf16.mxu1 %v537_v1 }
  0x46   :  { %419 = vmatpush3.bf16.msra.mxu0 %v458_v14  ;;  %439 = vmatpush3.bf16.msra.mxu1 %v467_v18 }
  0x49   :  { %421 = vmatmul.mubr.bf16.vlgmr.msra.gmra.mxu0 %v459_v15 }
 0x109   :  { %v184_v20 = vpop.f32.mrf.mxu0 }
 0x10a   :  { %v207_v21 = vadd.f32 %v374_v19, %v184_v20 }
 0x10b   :  { %v422_v22 = vpop.f32.mrf.mxu0 }
 0x10c   :  { %v211_v24 = vmul.f32 0.1, %v207_v21  ;;  %vm209_vm1 = vcmp.gt.f32.partialorder %v207_v21, 0.0 }
 0x10d   :  { %v187_v23 = vpop.f32.mrf.mxu0 }
 0x10e   :  { %v208_v25 = vadd.f32 %v374_v19, %v187_v23  ;;  %v213_v28 = vsel %vm209_vm1, %v207_v21, %v211_v24 }
 0x10f   :  { %v423_v26 = vpop.f32.mrf.mxu0 }
 0x110   :  { %vm210_vm2 = vcmp.gt.f32.partialorder %v208_v25, 0.0  ;;  %v212_v27 = vmul.f32 0.1, %v208_v25 }
 0x112   :  { %v214_v29 = vsel %vm210_vm2, %v208_v25, %v212_v27 }
 0x113   :  { %v215_v30 = vpack.c.bf16 %v214_v29, %v213_v28 }
 0x115   :  { %441 = vmatmul.mubr.bf16.vlgmr.msra.gmra.mxu1 %v215_v30 }
 0x1d5   :  { %v321_v32 = vpop.f32.mrf.mxu1 }
 0x1d6   :  { %v322_v33 = vadd.f32 %v375_v31, %v321_v32 }
 0x1d7   :  { %v442_v34 = vpop.f32.mrf.mxu1 }
 0x1d8   :  { %v330_v35 = vmul.f32 0.1, %v322_v33  ;;  %vm328_vm3 = vcmp.gt.f32.partialorder %v322_v33, 0.0 }
 0x1d9   :  { %v324_v37 = vpop.f32.mrf.mxu1 }
 0x1da   :  { %v325_v38 = vadd.f32 %v375_v31, %v324_v37  ;;  %v332_v39 = vsel %vm328_vm3, %v322_v33, %v330_v35 }
 0x1db   :  { %v443_v40 = vpop.f32.mrf.mxu1  ;;  %v341_v41 = vmul.f32 %v384_v36, %v332_v39 }
 0x1dc   :  { %v331_v42 = vmul.f32 0.1, %v325_v38  ;;  %vm329_vm4 = vcmp.gt.f32.partialorder %v325_v38, 0.0 }
 0x1dd   :  { %343 = vadd.xlane.f32.xlu0 %v341_v41 }
 0x1de   :  { %v333_v43 = vsel %vm329_vm4, %v325_v38, %v331_v42 }
 0x1df   :  { %v342_v44 = vmul.f32 %v384_v36, %v333_v43 }
 0x1e1   :  { %345 = vadd.xlane.f32.xlu0 %v342_v44 }
 0x266   :  { %v344_v46 = vpop.xlane.xlu0 %343 }
 0x267   :  { %v354_v47 = vadd.f32 %v385_v45, %v344_v46 }
 0x269   :  { %357 = vst.msk [vmem:[%s613_s7] sm:$0xff] %vm356_vm5, %v354_v47 }
 0x26a   :  { %v346_v48 = vpop.xlane.xlu0 %345 }
 0x26b   :  { %v355_v49 = vadd.f32 %v385_v45, %v346_v48 }
 0x26d   :  { %358 = vst.msk [vmem:[%s613_s7 + $0x8] sm:$0xff] %vm356_vm5, %v355_v49 }
 0x26e   :  { %363 = vsyncpa [#allocation5], 1 }
 0x26f   :  { %364 = vsyncpa [#allocation7], 1 }

</bundles_post_ra>
